<compile_context>
chip_gen: v7x
topology: tpu7x:2x2x1
jax: 0.10.0
libtpu: 0.0.40
codegen_flags: <defaults>
</compile_context>

<pallas_src>
import jax
import jax.numpy as jnp
from jax.experimental import pallas as pl
from jax.experimental.pallas import tpu as pltpu

HIDDEN = 64
_MAX_TB = 32768  # batch-tile cap: keeps per-step VMEM comfortably under v7x's 64 MiB


def pi_network_kernel(obs_ref, w1_ref, b1_ref, w2_ref, b2_ref, w3t_ref, b3_ref,
                      out_ref):
    # obs_ref: (tb, obs_dim) batch-major.  w1: (64, obs_dim), w2: (64, 64),
    # w3t: (64, action_dim) with the action rescale folded in.  b1/b2 are (64, 1)
    # columns (broadcast over the tb lane axis), b3 is a (1, action_dim) row.
    high = jax.lax.Precision.HIGHEST  # true-f32 matmuls (keeps 1e-5 vs f32 reference)

    # fc1: contract over obs_dim with obs in its natural layout ("q @ k.T" pattern)
    # -> feature-major (64, tb), so tanh is lane-dense.
    z1 = jax.lax.dot_general(
        w1_ref[...], obs_ref[...], (((1,), (1,)), ((), ())),
        precision=high, preferred_element_type=jnp.float32)
    h = jnp.tanh(z1 + b1_ref[...])

    # fc2: standard feature-major matmul, lane-dense tanh.
    h = jnp.tanh(
        jnp.dot(w2_ref[...], h, precision=high,
                preferred_element_type=jnp.float32) + b2_ref[...])

    # fc3 (+ folded action-bound rescale): contract over HIDDEN -> batch-major
    # (tb, action_dim), written straight into the (B, action_dim) output.
    out_ref[...] = jax.lax.dot_general(
        h, w3t_ref[...], (((0,), (0,)), ((), ())),
        precision=high, preferred_element_type=jnp.float32) + b3_ref[...]


def _pick_batch_tile(B, block_b):
    """Big tiles amortize the ~0.35us/grid-step overhead; cap for v7x VMEM (64 MiB)
    and keep >= 2 grid steps on large batches so ("parallel",) can span both v7x TCs."""
    block_b = max(128, (min(block_b, _MAX_TB) // 128) * 128)
    if B <= min(2048, block_b):
        return B                                   # small batch: one full tile
    half = ((B + 1) // 2 + 127) // 128 * 128       # >= 2 grid steps, 128-aligned
    return min(block_b, max(128, half))


def pi_network_forward(obs, kparams, *, block_b=16384):
    """obs: (B, obs_dim) f32 in natural layout.  kparams: folded params (fold_params)."""
    B, obs_dim = obs.shape
    action_dim = kparams["w3t"].shape[1]

    tb = _pick_batch_tile(B, block_b)
    grid = (pl.cdiv(B, tb),)

    const = lambda i: (0, 0)  # weights/biases: same block every step -> VMEM-resident
    in_specs = [
        pl.BlockSpec((tb, obs_dim), lambda i: (i, 0)),   # obs, batch-major
        pl.BlockSpec((HIDDEN, obs_dim), const),          # w1
        pl.BlockSpec((HIDDEN, 1), const),                # b1 (column)
        pl.BlockSpec((HIDDEN, HIDDEN), const),           # w2
        pl.BlockSpec((HIDDEN, 1), const),                # b2 (column)
        pl.BlockSpec((HIDDEN, action_dim), const),       # w3t (rescale folded)
        pl.BlockSpec((1, action_dim), const),            # b3  (rescale folded)
    ]
    out_specs = pl.BlockSpec((tb, action_dim), lambda i: (i, 0))

    flops = 2 * B * (obs_dim * HIDDEN + HIDDEN * HIDDEN + HIDDEN * action_dim)
    transcendentals = 2 * HIDDEN * B
    weight_bytes = 4 * (HIDDEN * obs_dim + HIDDEN + HIDDEN * HIDDEN + HIDDEN
                        + HIDDEN * action_dim + action_dim)
    bytes_accessed = 4 * B * (obs_dim + action_dim) + weight_bytes

    # Per-step VMEM: double-buffered obs/out tiles + a few (64, tb) f32 intermediates.
    # Raise the scoped limit (v5e default is only 16 MiB) but stay <= v7x's 64 MiB.
    per_step = 4 * tb * (2 * (obs_dim + action_dim) + 6 * HIDDEN)
    vmem_limit = int(min(max(per_step + (8 << 20), 32 << 20), 64 << 20))

    return pl.pallas_call(
        pi_network_kernel,
        out_shape=jax.ShapeDtypeStruct((B, action_dim), jnp.float32),
        grid=grid,
        in_specs=in_specs,
        out_specs=out_specs,
        compiler_params=pltpu.CompilerParams(
            dimension_semantics=("parallel",),
            vmem_limit_bytes=vmem_limit,
        ),
        cost_estimate=pl.CostEstimate(
            flops=flops,
            transcendentals=transcendentals,
            bytes_accessed=bytes_accessed,
        ),
    )(obs, kparams["w1"], kparams["b1"], kparams["w2"], kparams["b2"],
      kparams["w3t"], kparams["b3"])


def init_params(key, obs_dim, action_dim, action_lower_bound, action_upper_bound):
    """Raw params in PyTorch orientation (weight = (out_features, in_features))."""
    k1, k2, k3, k4, k5, k6 = jax.random.split(key, 6)
    # fc1.weight: explicit uniform(-0.05, 0.05) as in PI_Network.initialize_weights().
    w1 = jax.random.uniform(k1, (HIDDEN, obs_dim), jnp.float32, -0.05, 0.05)
    # Remaining params: PyTorch default Linear init uniform(-1/sqrt(fan_in), 1/sqrt(fan_in)).
    b1_bound = 1.0 / (obs_dim ** 0.5)
    b1 = jax.random.uniform(k2, (HIDDEN,), jnp.float32, -b1_bound, b1_bound)
    h_bound = 1.0 / (HIDDEN ** 0.5)
    w2 = jax.random.uniform(k3, (HIDDEN, HIDDEN), jnp.float32, -h_bound, h_bound)
    b2 = jax.random.uniform(k4, (HIDDEN,), jnp.float32, -h_bound, h_bound)
    w3 = jax.random.uniform(k5, (action_dim, HIDDEN), jnp.float32, -h_bound, h_bound)
    b3 = jax.random.uniform(k6, (action_dim,), jnp.float32, -h_bound, h_bound)
    lb = jnp.asarray(action_lower_bound, jnp.float32)
    ub = jnp.asarray(action_upper_bound, jnp.float32)
    return {"w1": w1, "b1": b1, "w2": w2, "b2": b2, "w3": w3, "b3": b3,
            "lb": lb, "ub": ub}


def fold_params(params):
    """One-time prep: fold (a + 1)*(ub - lb)/2 + lb into fc3; biases -> broadcastable 2-D
    blocks; fc3 weight stored transposed (HIDDEN, action_dim) so the kernel's final
    contraction writes batch-major output directly."""
    scale = 0.5 * (params["ub"] - params["lb"])               # (action_dim,)
    w3t = (params["w3"] * scale[:, None]).T                   # (HIDDEN, action_dim)
    b3f = params["b3"] * scale + scale + params["lb"]         # (action_dim,)
    return {
        "w1": params["w1"],
        "b1": params["b1"].reshape(HIDDEN, 1),
        "w2": params["w2"],
        "b2": params["b2"].reshape(HIDDEN, 1),
        "w3t": w3t,
        "b3": b3f.reshape(1, -1),
    }


def pi_network_ref(obs, p):
    # Pure-JAX reference matching the PyTorch module exactly (no tanh on fc3, just the
    # affine rescale).  Precision pinned so the 1e-5 comparison is against true f32.
    high = jax.lax.Precision.HIGHEST
    x = jnp.tanh(jnp.dot(obs, p["w1"].T, precision=high) + p["b1"])
    x = jnp.tanh(jnp.dot(x, p["w2"].T, precision=high) + p["b2"])
    a = jnp.dot(x, p["w3"].T, precision=high) + p["b3"]
    return (a + 1.0) * (p["ub"] - p["lb"]) * 0.5 + p["lb"]


if __name__ == "__main__":
    key = jax.random.PRNGKey(0)
    obs_dim, action_dim, batch = 8, 4, 2
    action_lower_bound = [-1.0, -2.0, 0.0, -0.5]
    action_upper_bound = [1.0, 2.0, 1.0, 0.5]

    kp, ko, ko2 = jax.random.split(key, 3)
    params = init_params(kp, obs_dim, action_dim,
                         action_lower_bound, action_upper_bound)
    kparams = fold_params(params)

    # Small-shape check (single full-batch tile).
    obs = jax.random.normal(ko, (batch, obs_dim), jnp.float32)
    out = jax.block_until_ready(pi_network_forward(obs, kparams))
    ref = pi_network_ref(obs, params)
    assert out.shape == (batch, action_dim)
    assert jnp.allclose(out, ref, atol=1e-5, rtol=1e-5)

    # Ragged multi-step grid check (B % tb != 0, >1 grid step): B=300, tile=256.
    obs2 = jax.random.normal(ko2, (300, obs_dim), jnp.float32)
    out2 = jax.block_until_ready(pi_network_forward(obs2, kparams, block_b=256))
    ref2 = pi_network_ref(obs2, params)
    assert out2.shape == (300, action_dim)
    assert jnp.allclose(out2, ref2, atol=1e-5, rtol=1e-5)

    print("KERNEL_OK")
</pallas_src>

<mosaic_0001>
module attributes {stable_mosaic.version = 11 : i64} {
  func.func @pi_network_kernel(%arg0: i32, %arg1: memref<2x8xf32, #tpu.memory_space<vmem>>, %arg2: memref<64x8xf32, #tpu.memory_space<vmem>>, %arg3: memref<64x1xf32, #tpu.memory_space<vmem>>, %arg4: memref<64x64xf32, #tpu.memory_space<vmem>>, %arg5: memref<64x1xf32, #tpu.memory_space<vmem>>, %arg6: memref<64x4xf32, #tpu.memory_space<vmem>>, %arg7: memref<1x4xf32, #tpu.memory_space<vmem>>, %arg8: memref<2x4xf32, #tpu.memory_space<vmem>>) attributes {dimension_semantics = [#tpu.dimension_semantics<parallel>], iteration_bounds = array<i64: 1>, scalar_prefetch = 0 : i64, scratch_operands = 0 : i64, tpu.core_type = #tpu.core_type<tc>, window_params = [{transform_indices = @transform_0, window_bounds = array<i64: 2, 8>}, {pipeline_mode = #tpu.pipeline_mode<synchronous>, transform_indices = @transform_1, window_bounds = array<i64: 64, 8>}, {pipeline_mode = #tpu.pipeline_mode<synchronous>, transform_indices = @transform_2, window_bounds = array<i64: 64, 1>}, {pipeline_mode = #tpu.pipeline_mode<synchronous>, transform_indices = @transform_3, window_bounds = array<i64: 64, 64>}, {pipeline_mode = #tpu.pipeline_mode<synchronous>, transform_indices = @transform_4, window_bounds = array<i64: 64, 1>}, {pipeline_mode = #tpu.pipeline_mode<synchronous>, transform_indices = @transform_5, window_bounds = array<i64: 64, 4>}, {pipeline_mode = #tpu.pipeline_mode<synchronous>, transform_indices = @transform_6, window_bounds = array<i64: 1, 4>}, {transform_indices = @transform_7, window_bounds = array<i64: 2, 4>}]} {
    %c0 = arith.constant 0 : index
    %c0_0 = arith.constant 0 : index
    %0 = vector.load %arg2[%c0, %c0_0] : memref<64x8xf32, #tpu.memory_space<vmem>>, vector<64x8xf32>
    %c0_1 = arith.constant 0 : index
    %c0_2 = arith.constant 0 : index
    %1 = vector.load %arg1[%c0_1, %c0_2] : memref<2x8xf32, #tpu.memory_space<vmem>>, vector<2x8xf32>
    %cst = arith.constant dense<0.000000e+00> : vector<64x2xf32>
    %2 = tpu.matmul %0, %1, %cst {dimension_numbers = #tpu.dot_dimension_numbers<[1], [1], [0], [0], [0, 0, 1, 0], [], []>, precision = #tpu.contract_precision<fp32>} : vector<64x8xf32>, vector<2x8xf32>, vector<64x2xf32> -> vector<64x2xf32>
    %c0_3 = arith.constant 0 : index
    %c0_4 = arith.constant 0 : index
    %3 = vector.load %arg3[%c0_3, %c0_4] : memref<64x1xf32, #tpu.memory_space<vmem>>, vector<64x1xf32>
    %4 = vector.broadcast %3 : vector<64x1xf32> to vector<64x2xf32>
    %5 = arith.addf %2, %4 : vector<64x2xf32>
    %6 = math.tanh %5 : vector<64x2xf32>
    %c0_5 = arith.constant 0 : index
    %c0_6 = arith.constant 0 : index
    %7 = vector.load %arg4[%c0_5, %c0_6] : memref<64x64xf32, #tpu.memory_space<vmem>>, vector<64x64xf32>
    %cst_7 = arith.constant dense<0.000000e+00> : vector<64x2xf32>
    %8 = tpu.matmul %7, %6, %cst_7 {dimension_numbers = #tpu.dot_dimension_numbers<[1], [0], [0], [1], [0, 0, 1, 1], [], []>, precision = #tpu.contract_precision<fp32>} : vector<64x64xf32>, vector<64x2xf32>, vector<64x2xf32> -> vector<64x2xf32>
    %c0_8 = arith.constant 0 : index
    %c0_9 = arith.constant 0 : index
    %9 = vector.load %arg5[%c0_8, %c0_9] : memref<64x1xf32, #tpu.memory_space<vmem>>, vector<64x1xf32>
    %10 = vector.broadcast %9 : vector<64x1xf32> to vector<64x2xf32>
    %11 = arith.addf %8, %10 : vector<64x2xf32>
    %12 = math.tanh %11 : vector<64x2xf32>
    %c0_10 = arith.constant 0 : index
    %c0_11 = arith.constant 0 : index
    %13 = vector.load %arg6[%c0_10, %c0_11] : memref<64x4xf32, #tpu.memory_space<vmem>>, vector<64x4xf32>
    %cst_12 = arith.constant dense<0.000000e+00> : vector<2x4xf32>
    %14 = tpu.matmul %12, %13, %cst_12 {dimension_numbers = #tpu.dot_dimension_numbers<[0], [0], [1], [1], [0, 1, 1, 1], [], []>, precision = #tpu.contract_precision<fp32>} : vector<64x2xf32>, vector<64x4xf32>, vector<2x4xf32> -> vector<2x4xf32>
    %c0_13 = arith.constant 0 : index
    %c0_14 = arith.constant 0 : index
    %15 = vector.load %arg7[%c0_13, %c0_14] : memref<1x4xf32, #tpu.memory_space<vmem>>, vector<1x4xf32>
    %16 = vector.broadcast %15 : vector<1x4xf32> to vector<2x4xf32>
    %17 = arith.addf %14, %16 : vector<2x4xf32>
    %c0_15 = arith.constant 0 : index
    %c0_16 = arith.constant 0 : index
    %18 = vector.load %arg8[%c0_15, %c0_16] : memref<2x4xf32, #tpu.memory_space<vmem>>, vector<2x4xf32>
    tpu.vector_store %arg8[%c0_15, %c0_16], %17 {strides = array<i32>} : memref<2x4xf32, #tpu.memory_space<vmem>>, vector<2x4xf32>,
    return
  }
  func.func @transform_0(%arg0: i32) -> (i32, i32) {
    %c0_i32 = arith.constant 0 : i32
    %c0_i32_0 = arith.constant 0 : i32
    return %arg0, %c0_i32 : i32, i32
  }
  func.func @transform_1(%arg0: i32) -> (i32, i32) {
    %c0_i32 = arith.constant 0 : i32
    %c0_i32_0 = arith.constant 0 : i32
    %c0_i32_1 = arith.constant 0 : i32
    return %c0_i32, %c0_i32_0 : i32, i32
  }
  func.func @transform_2(%arg0: i32) -> (i32, i32) {
    %c0_i32 = arith.constant 0 : i32
    %c0_i32_0 = arith.constant 0 : i32
    %c0_i32_1 = arith.constant 0 : i32
    return %c0_i32, %c0_i32_0 : i32, i32
  }
  func.func @transform_3(%arg0: i32) -> (i32, i32) {
    %c0_i32 = arith.constant 0 : i32
    %c0_i32_0 = arith.constant 0 : i32
    %c0_i32_1 = arith.constant 0 : i32
    return %c0_i32, %c0_i32_0 : i32, i32
  }
  func.func @transform_4(%arg0: i32) -> (i32, i32) {
    %c0_i32 = arith.constant 0 : i32
    %c0_i32_0 = arith.constant 0 : i32
    %c0_i32_1 = arith.constant 0 : i32
    return %c0_i32, %c0_i32_0 : i32, i32
  }
  func.func @transform_5(%arg0: i32) -> (i32, i32) {
    %c0_i32 = arith.constant 0 : i32
    %c0_i32_0 = arith.constant 0 : i32
    %c0_i32_1 = arith.constant 0 : i32
    return %c0_i32, %c0_i32_0 : i32, i32
  }
  func.func @transform_6(%arg0: i32) -> (i32, i32) {
    %c0_i32 = arith.constant 0 : i32
    %c0_i32_0 = arith.constant 0 : i32
    %c0_i32_1 = arith.constant 0 : i32
    return %c0_i32, %c0_i32_0 : i32, i32
  }
  func.func @transform_7(%arg0: i32) -> (i32, i32) {
    %c0_i32 = arith.constant 0 : i32
    %c0_i32_0 = arith.constant 0 : i32
    return %arg0, %c0_i32 : i32, i32
  }
}

</mosaic_0001>

<bundles_post_ra>
// kernel: tpu_custom_call.1
= control target key start
LH: loop header
LB: loop body
LE: loop exit
PB: predicated region body
PF: predicated region fallthrough
CT: control target
= control target key end

     0   :  { %vm84_vm0 = vcmask 64512   ;;  %v3305_v9 = vmov 0   ;;  %s4009_s0 = inlined_call_operand.vmem [shape: f32[2,8], index: 0, kind: input, shape index: {}]   ;;  %s4010_s1 = inlined_call_operand.vmem [shape: f32[64,8], index: 1, kind: input, shape index: {}]   ;;  %s4011_s2 = inlined_call_operand.vmem [shape: f32[64,1], index: 2, kind: input, shape index: {}]   ;;  %s4012_s3 = inlined_call_operand.vmem [shape: f32[64,64], index: 3, kind: input, shape index: {}]   ;;  %s4013_s4 = inlined_call_operand.vmem [shape: f32[64,1], index: 4, kind: input, shape index: {}]   ;;  %s4014_s5 = inlined_call_operand.vmem [shape: f32[64,4], index: 5, kind: input, shape index: {}]   ;;  %s4015_s6 = inlined_call_operand.vmem [shape: f32[1,4], index: 6, kind: input, shape index: {}]   ;;  %s4016_s7 = inlined_call_operand.hbm [shape: f32[2,4], index: 7, kind: output, shape index: {}]  }
   0x1   :  { %v35_v0 = vld [vmem:[%s4009_s0] sm:$0x3]  ;;  %v28_v2 = vld [vmem:[%s4010_s1 + $0x8] sm:$0xff]  ;;  %v29_v6 = vld [vmem:[%s4010_s1 + $0x10] sm:$0xff]  ;;  %3247 = vset.pattern.permute.xlu0 %v3305_v9  ;;  %3248 = vset.pattern.permute.xlu1 %v3305_v9 }
   0x2   :  { %v27_v1 = vld [vmem:[%s4010_s1] sm:$0xff]  ;;  %v110_v3 = vsel %vm84_vm0, %v35_v0, 0  ;;  %v89_v5 = vsel %vm84_vm0, %v28_v2, 0  ;;  %v30_v7 = vld [vmem:[%s4010_s1 + $0x18] sm:$0xff]  ;;  %v92_v13 = vsel %vm84_vm0, %v29_v6, 0  ;;  %v32_v14 = vld [vmem:[%s4010_s1 + $0x28] sm:$0xff] }
   0x3   :  { %v86_v4 = vsel %vm84_vm0, %v27_v1, 0  ;;  %v31_v8 = vld [vmem:[%s4010_s1 + $0x20] sm:$0xff]  ;;  %v3371_v10 = vand.u32 4294901760, %v110_v3  ;;  %v3375_v12 = vand.u32 4294901760, %v89_v5  ;;  %v33_v15 = vld [vmem:[%s4010_s1 + $0x30] sm:$0xff]  ;;  %v3384_v16 = vand.u32 4294901760, %v92_v13 }
   0x4   :  { %v3373_v11 = vand.u32 4294901760, %v86_v4  ;;  %v95_v17 = vsel %vm84_vm0, %v30_v7, 0  ;;  %v98_v18 = vsel %vm84_vm0, %v31_v8, 0  ;;  %v101_v19 = vsel %vm84_vm0, %v32_v14, 0  ;;  %v34_v20 = vld [vmem:[%s4010_s1 + $0x38] sm:$0xff]  ;;  %v36_v21 = vld [vmem:[%s4011_s2] sm:$0xff] }
   0x5   :  { %v3396_v22 = vsub.f32 %v110_v3, %v3371_v10  ;;  %v3402_v24 = vsub.f32 %v89_v5, %v3375_v12  ;;  %v3404_v25 = vand.u32 4294901760, %v95_v17  ;;  %2602 = vmatprep.subr.mxu1 %v3371_v10  ;;  %46 = vperm.xlu0 %3247, %v36_v21   ;;  %v38_v26 = vld [vmem:[%s4011_s2 + $0x10] sm:$0xff]  ;;  %v3411_v27 = vsub.f32 %v92_v13, %v3384_v16  ;;  %v37_v31 = vld [vmem:[%s4011_s2 + $0x8] sm:$0xff]  ;;  %v39_v36 = vld [vmem:[%s4011_s2 + $0x18] sm:$0xff] }
   0x6   :  { %v3399_v23 = vsub.f32 %v86_v4, %v3373_v11  ;;  %v3413_v28 = vand.u32 4294901760, %v98_v18  ;;  %v3415_v29 = vand.u32 4294901760, %v101_v19  ;;  %2603 = vmatpush3.xpose.msra.mxu1 %v3371_v10  ;;  %v104_v30 = vsel %vm84_vm0, %v33_v15, 0  ;;  %56 = vperm.xlu1 %3248, %v38_v26  }
   0x7   :  { %2630 = vmatprep.subr.mxu0 %v3396_v22  ;;  %v3425_v32 = vsub.f32 %v95_v17, %v3404_v25  ;;  %v3427_v33 = vand.u32 4294901760, %v104_v30  ;;  %v107_v35 = vsel %vm84_vm0, %v34_v20, 0  ;;  %v190_v40 = vand.u32 4294901760, %v3402_v24 }
   0x8   :  { %2632 = vmatprep.mubr.f32.mxu0 %v3399_v23  ;;  %v180_v34 = vand.u32 4294901760, %v3399_v23  ;;  %2631 = vmatpush3.xpose.msra.mxu0 %v3396_v22  ;;  %v3436_v37 = vsub.f32 %v98_v18, %v3413_v28  ;;  %v3439_v38 = vsub.f32 %v101_v19, %v3415_v29  ;;  %v3441_v39 = vand.u32 4294901760, %v107_v35 }
   0x9   :  { %2644 = vmatprep.subr.mxu0 %v3371_v10  ;;  %v3446_v41 = vsub.f32 %v104_v30, %v3427_v33  ;;  %v200_v43 = vand.u32 4294901760, %v3411_v27  ;;  %v3453_v44 = vand.u32 4294901760, %v3396_v22  ;;  %51 = vperm.xlu0 %3247, %v37_v31   ;;  %v191_v45 = vsub.f32 %v3402_v24, %v190_v40 }
   0xa   :  { %v181_v42 = vsub.f32 %v3399_v23, %v180_v34  ;;  %v210_v46 = vand.u32 4294901760, %v3425_v32  ;;  %v220_v47 = vand.u32 4294901760, %v3436_v37  ;;  %61 = vperm.xlu1 %3248, %v39_v36  }
   0xb   :  { %12 = vsyncpa [#allocation3], 0  ;;  %2633 = vmatmul.mubr.f32.vlgmr.msra.gmra.mrb[0].mxu0 %v3402_v24  ;;  %v201_v49 = vsub.f32 %v3411_v27, %v200_v43  ;;  %v230_v50 = vand.u32 4294901760, %v3439_v38  ;;  %v240_v51 = vand.u32 4294901760, %v3446_v41  ;;  %v40_v52 = vld [vmem:[%s4011_s2 + $0x20] sm:$0xff]  ;;  %v3472_v53 = vsub.f32 %v107_v35, %v3441_v39  ;;  %v41_v59 = vld [vmem:[%s4011_s2 + $0x28] sm:$0xff] }
   0xc   :  { %v182_v48 = vand.u32 4294901760, %v181_v42  ;;  %2645 = vmatpush3.xpose.msra.mxu0 %v3371_v10  ;;  %2635 = vmatprep.mubr.f32.mxu0 %v3411_v27  ;;  %v192_v54 = vand.u32 4294901760, %v191_v45  ;;  %v211_v55 = vsub.f32 %v3425_v32, %v210_v46  ;;  %v221_v56 = vsub.f32 %v3436_v37, %v220_v47  ;;  %v42_v2 = vld [vmem:[%s4011_s2 + $0x30] sm:$0xff]  ;;  %v43_v5 = vld [vmem:[%s4011_s2 + $0x38] sm:$0xff]  ;;  %v875_v7 = vld [vmem:[%s4013_s4] sm:$0xff]  ;;  %s3309_s27 = smov [#allocation2]  }
   0xd   :  { %v202_v57 = vand.u32 4294901760, %v201_v49  ;;  %2658 = vmatprep.subr.mxu0 %v3453_v44  ;;  %v262_v58 = vsub.f32 %v3396_v22, %v3453_v44  ;;  %v231_v61 = vsub.f32 %v3439_v38, %v230_v50  ;;  %v250_v62 = vand.u32 4294901760, %v3472_v53  ;;  %66 = vperm.xlu0 %3247, %v40_v52   ;;  %v876_v9 = vld [vmem:[%s4013_s4 + $0x8] sm:$0xff]  ;;  %v877_v13 = vld [vmem:[%s4013_s4 + $0x10] sm:$0xff]  ;;  %v878_v14 = vld [vmem:[%s4013_s4 + $0x18] sm:$0xff]  ;;  %s2389_s28 = sshll.u32 %s3309_s27, 4  ;;  %s2390_s28 = int_to_ptr.vmem [resolvable:$true] %s2389_s28 }
   0xe   :  { %2604 = vmatprep.mubr.f32.mxu1 %v182_v48  ;;  %v212_v60 = vand.u32 4294901760, %v211_v55  ;;  %v222_v63 = vand.u32 4294901760, %v221_v56  ;;  %v241_v0 = vsub.f32 %v3446_v41, %v240_v51  ;;  %71 = vperm.xlu1 %3248, %v41_v59   ;;  %v879_v15 = vld [vmem:[%s4013_s4 + $0x20] sm:$0xff]  ;;  %v880_v17 = vld [vmem:[%s4013_s4 + $0x28] sm:$0xff]  ;;  %v881_v18 = vld [vmem:[%s4013_s4 + $0x30] sm:$0xff]  ;;  %vm923_vm1 = vcmask 523264   ;;  %p3286_p1 = scmp.lt.s32.totalorder %s2390_s28, %s2390_s28 }
   0xf   :  { %2605 = vmatmul.mubr.f32.vlgmr.msra.gmra.mrb[0].mxu1 %v192_v54  ;;  %2636 = vmatmul.mubr.f32.gmra.mrb[2].mxu0 %v3425_v32  ;;  %v263_v1 = vand.u32 4294901760, %v262_v58  ;;  %v232_v3 = vand.u32 4294901760, %v231_v61  ;;  %v251_v4 = vsub.f32 %v3472_v53, %v250_v62  ;;  %v882_v19 = vld [vmem:[%s4013_s4 + $0x38] sm:$0xff]  ;;  %vm3307_vm2 = vmmov 0   ;;  %s3281_s29 = scalar_lea.vmem %s2390_s28, 32 }
  0x10   :  { %2607 = vmatprep.mubr.f32.mxu1 %v202_v57  ;;  %2638 = vmatprep.mubr.f32.mxu0 %v3436_v37  ;;  %v242_v6 = vand.u32 4294901760, %v241_v0  ;;  %vm2381_vm3 = vcmask 25600   ;;  %p3282_p0 = scmp.ne.s32.totalorder %s2390_s28, %s3281_s29  ;;  %p3287_p2 = scmp.lt.s32.totalorder %s3281_s29, %s3281_s29 }
  0x11   :  { %2616 = vmatprep.subr.mxu1 %v263_v1  ;;  %76 = vperm.xlu0 %3247, %v42_v2   ;;  %v252_v8 = vand.u32 4294901760, %v251_v4 }
  0x12   :  { %2617 = vmatpush3.xpose.msra.mxu1 %v263_v1  ;;  %81 = vperm.xlu1 %3248, %v43_v5   ;;  %p3288_p3 = por %p3287_p2, %p3286_p1 }
  0x13   :  { %2608 = vmatmul.mubr.f32.gmra.mrb[2].mxu1 %v212_v60  ;;  %2639 = vmatmul.mubr.f32.gmra.mrb[4].mxu0 %v3439_v38  ;;  %v869_v38 = vld [vmem:[%s4012_s3 + $0x10] sm:$0xff] }
  0x14   :  { %2610 = vmatprep.mubr.f32.mxu1 %v222_v63  ;;  %2641 = vmatprep.mubr.f32.mxu0 %v3446_v41  ;;  %p3289_p4 = pnand %p3288_p3, %p3282_p0 }
  0x15   :  { %885 = vperm.xlu0 %3247, %v875_v7  }
  0x16   :  { %890 = vperm.xlu1 %3248, %v876_v9   ;;  %v872_v9 = vld [vmem:[%s4012_s3 + $0x28] sm:$0xff] }
  0x17   :  { %2611 = vmatmul.mubr.f32.gmra.mrb[4].mxu1 %v232_v3  ;;  %2642 = vmatmul.mubr.f32.gmra.mrb[6].mxu0 %v3472_v53 }
  0x18   :  { %2613 = vmatprep.mubr.f32.mxu1 %v242_v6  ;;  %2646 = vmatprep.mubr.f32.mxu0 %v180_v34 }
  0x19   :  { %895 = vperm.xlu0 %3247, %v877_v13  }
  0x1a   :  { %900 = vperm.xlu1 %3248, %v878_v14  }
  0x1b   :  { %2614 = vmatmul.mubr.f32.gmra.mrb[6].mxu1 %v252_v8  ;;  %2647 = vmatmul.mubr.f32.vlgmr.msra.gmra.mrb[0].mxu0 %v190_v40 }
  0x1c   :  { %2618 = vmatprep.mubr.f32.mxu1 %v3373_v11  ;;  %2659 = vmatpush3.xpose.msra.mxu0 %v3453_v44  ;;  %v870_v44 = vld [vmem:[%s4012_s3 + $0x18] sm:$0xff] }
  0x1d   :  { %2649 = vmatprep.mubr.f32.mxu0 %v200_v43  ;;  %2672 = vmatprep.subr.mxu0 %v3371_v10 }
  0x1e   :  { %905 = vperm.xlu0 %3247, %v879_v15   ;;  %910 = vperm.xlu1 %3248, %v880_v17  }
  0x1f   :  { %2619 = vmatmul.mubr.f32.vlgmr.msra.gmra.mrb[0].mxu1 %v3375_v12  ;;  %2650 = vmatmul.mubr.f32.gmra.mrb[2].mxu0 %v210_v46  ;;  %v931_v46 = vsel %vm923_vm1, %v869_v38, 0 }
  0x20   :  { %2621 = vmatprep.mubr.f32.mxu1 %v3384_v16  ;;  %2652 = vmatprep.mubr.f32.mxu0 %v220_v47  ;;  %v3600_v56 = vand.u32 4294901760, %v931_v46 }
  0x22   :  { %915 = vperm.xlu0 %3247, %v881_v18   ;;  %920 = vperm.xlu1 %3248, %v882_v19   ;;  %v3609_v2 = vsub.f32 %v931_v46, %v3600_v56 }
  0x23   :  { %2622 = vmatmul.mubr.f32.gmra.mrb[2].mxu1 %v3404_v25  ;;  %2653 = vmatmul.mubr.f32.gmra.mrb[4].mxu0 %v230_v50 }
  0x24   :  { %2624 = vmatprep.mubr.f32.mxu1 %v3413_v28  ;;  %2655 = vmatprep.mubr.f32.mxu0 %v240_v51  ;;  %v934_v51 = vsel %vm923_vm1, %v870_v44, 0 }
  0x25   :  { %v3602_v59 = vand.u32 4294901760, %v934_v51 }
  0x27   :  { %2625 = vmatmul.mubr.f32.gmra.mrb[4].mxu1 %v3415_v29  ;;  %2656 = vmatmul.mubr.f32.gmra.mrb[6].mxu0 %v250_v62  ;;  %v871_v62 = vld [vmem:[%s4012_s3 + $0x20] sm:$0xff]  ;;  %v3612_v7 = vsub.f32 %v934_v51, %v3602_v59 }
  0x28   :  { %2627 = vmatprep.mubr.f32.mxu1 %v3427_v33  ;;  %2660 = vmatprep.mubr.f32.mxu0 %v3373_v11  ;;  %v937_v8 = vsel %vm923_vm1, %v871_v62, 0 }
  0x2b   :  { %2628 = vmatmul.mubr.f32.gmra.mrb[6].mxu1 %v3441_v39  ;;  %2661 = vmatmul.mubr.f32.vlgmr.msra.gmra.mrb[0].mxu0 %v3375_v12 }
  0x2c   :  { %2673 = vmatpush3.xpose.msra.mxu0 %v3371_v10  ;;  %2663 = vmatprep.mubr.f32.mxu0 %v3384_v16  ;;  %v867_v10 = vld [vmem:[%s4012_s3] sm:$0xff] }
  0x2f   :  { %2664 = vmatmul.mubr.f32.gmra.mrb[2].mxu0 %v3404_v25 }
  0x30   :  { %2666 = vmatprep.mubr.f32.mxu0 %v3413_v28 }
  0x33   :  { %2667 = vmatmul.mubr.f32.gmra.mrb[4].mxu0 %v3415_v29 }
  0x34   :  { %2669 = vmatprep.mubr.f32.mxu0 %v3427_v33 }
  0x37   :  { %2670 = vmatmul.mubr.f32.gmra.mrb[6].mxu0 %v3441_v39 }
  0x38   :  { %2674 = vmatprep.mubr.f32.mxu0 %v3373_v11  ;;  %v925_v11 = vsel %vm923_vm1, %v867_v10, 0  ;;  %v1043_v10 = vand.u32 4294901760, %v3609_v2 }
  0x3a   :  { %v3642_v38 = vsub.f32 %v3609_v2, %v1043_v10 }
  0x3b   :  { %2675 = vmatmul.mubr.f32.vlgmr.msra.gmra.mrb[0].mxu0 %v3375_v12  ;;  %v3574_v12 = vand.u32 4294901760, %v925_v11 }
  0x3c   :  { %2677 = vmatprep.mubr.f32.mxu0 %v3384_v16 }
  0x3d   :  { %v3577_v16 = vsub.f32 %v925_v11, %v3574_v12 }
  0x3f   :  { %2678 = vmatmul.mubr.f32.gmra.mrb[2].mxu0 %v3404_v25  ;;  %v1023_v20 = vand.u32 4294901760, %v3577_v16 }
  0x40   :  { %2680 = vmatprep.mubr.f32.mxu0 %v3413_v28 }
  0x41   :  { %v1024_v21 = vsub.f32 %v3577_v16, %v1023_v20 }
  0x43   :  { %2681 = vmatmul.mubr.f32.gmra.mrb[4].mxu0 %v3415_v29  ;;  %v1025_v22 = vand.u32 4294901760, %v1024_v21 }
  0x44   :  { %2683 = vmatprep.mubr.f32.mxu0 %v3427_v33  ;;  %v868_v33 = vld [vmem:[%s4012_s3 + $0x8] sm:$0xff] }
  0x45   :  { %2702 = vmatprep.mubr.f32.mxu1 %v1025_v22  ;;  %v928_v36 = vsel %vm923_vm1, %v868_v33, 0  ;;  %v873_v33 = vld [vmem:[%s4012_s3 + $0x30] sm:$0xff] }
  0x46   :  { %v3590_v43 = vand.u32 4294901760, %v928_v36 }
  0x47   :  { %2684 = vmatmul.mubr.f32.gmra.mrb[6].mxu0 %v3441_v39 }
  0x48   :  { %v3598_v55 = vsub.f32 %v928_v36, %v3590_v43 }
  0x4a   :  { %v1033_v1 = vand.u32 4294901760, %v3598_v55 }
  0x4c   :  { %v3621_v19 = vsub.f32 %v3598_v55, %v1033_v1 }
  0x84   :  { %v47_v31 = vpop.permute.xlu0 %46 }
  0x85   :  { %v57_v32 = vpop.permute.xlu1 %56 }
  0x88   :  { %v52_v34 = vpop.permute.xlu0 %51 }
  0x89   :  { %v62_v35 = vpop.permute.xlu1 %61 }
  0x8c   :  { %v67_v52 = vpop.permute.xlu0 %66 }
  0x8d   :  { %v72_v48 = vpop.permute.xlu1 %71 }
  0x90   :  { %v77_v5 = vpop.permute.xlu0 %76 }
  0x91   :  { %v82_v3 = vpop.permute.xlu1 %81 }
  0xf2   :  { %v2620_v23 = vpop.f32.mrb[0].mxu1 }
  0xf3   :  { %v330_v24 = vpop.f32.mrb[1].mxu1  ;;  %v3136_v37 = vadd.f32 %v2620_v23, %v52_v34  ;;  %v3624_v23 = vand.u32 4294901760, %v937_v8  ;;  %v874_v34 = vld [vmem:[%s4012_s3 + $0x38] sm:$0xff] }
  0xf4   :  { %v3138_v39 = vadd.f32 %v330_v24, %v47_v31  ;;  %v940_v24 = vsel %vm923_vm1, %v872_v9, 0  ;;  %v1035_v31 = vand.u32 4294901760, %v3621_v19 }
  0xf6   :  { %v2623_v25 = vpop.f32.mrb[2].mxu1 }
  0xf7   :  { %v342_v26 = vpop.f32.mrb[3].mxu1  ;;  %v3140_v47 = vadd.f32 %v2623_v25, %v62_v35 }
  0xf8   :  { %v3142_v49 = vadd.f32 %v342_v26, %v57_v32  ;;  %v1053_v26 = vand.u32 4294901760, %v3612_v7  ;;  %v3631_v32 = vand.u32 4294901760, %v940_v24 }
  0xfa   :  { %v2626_v27 = vpop.f32.mrb[4].mxu1 }
  0xfb   :  { %v354_v28 = vpop.f32.mrb[5].mxu1  ;;  %v3144_v58 = vadd.f32 %v2626_v27, %v72_v48  ;;  %v946_v48 = vsel %vm923_vm1, %v874_v34, 0 }
  0xfc   :  { %v3146_v60 = vadd.f32 %v354_v28, %v67_v52 }
  0xfe   :  { %v2629_v29 = vpop.f32.mrb[6].mxu1 }
  0xff   :  { %v366_v30 = vpop.f32.mrb[7].mxu1  ;;  %v3148_v6 = vadd.f32 %v2629_v29, %v82_v3 }
 0x100   :  { %v3150_v13 = vadd.f32 %v366_v30, %v77_v5 }
 0x10e   :  { %v2676_v40 = vpop.f32.mrb[0].mxu0 }
 0x10f   :  { %v3137_v41 = vadd.f32 %v3136_v37, %v2676_v40  ;;  %v813_v42 = vpop.f32.mrb[1].mxu0 }
 0x110   :  { %v3139_v45 = vadd.f32 %v3138_v39, %v813_v42  ;;  %v3645_v39 = vsub.f32 %v937_v8, %v3624_v23  ;;  %v3651_v42 = vsub.f32 %v3612_v7, %v1053_v26  ;;  %v3671_v8 = vand.u32 4294901760, %v946_v48 }
 0x111   :  { %3249 = vtanh.f32 %v3137_v41 }
 0x112   :  { %3251 = vtanh.f32 %v3139_v45  ;;  %v2679_v50 = vpop.f32.mrb[2].mxu0  ;;  %v1063_v34 = vand.u32 4294901760, %v3645_v39 }
 0x113   :  { %v3141_v53 = vadd.f32 %v3140_v47, %v2679_v50  ;;  %v825_v54 = vpop.f32.mrb[3].mxu0  ;;  %v943_v47 = vsel %vm923_vm1, %v873_v33, 0 }
 0x114   :  { %v3143_v57 = vadd.f32 %v3142_v49, %v825_v54 }
 0x115   :  { %3253 = vtanh.f32 %v3141_v53 }
 0x116   :  { %3255 = vtanh.f32 %v3143_v57  ;;  %v2682_v61 = vpop.f32.mrb[4].mxu0 }
 0x117   :  { %v3145_v63 = vadd.f32 %v3144_v58, %v2682_v61  ;;  %v837_v0 = vpop.f32.mrb[5].mxu0  ;;  %v3663_v61 = vsub.f32 %v940_v24, %v3631_v32 }
 0x118   :  { %v3147_v4 = vadd.f32 %v3146_v60, %v837_v0 }
 0x119   :  { %3257 = vtanh.f32 %v3145_v63 }
 0x11a   :  { %3259 = vtanh.f32 %v3147_v4  ;;  %v2685_v14 = vpop.f32.mrb[6].mxu0 }
 0x11b   :  { %v3250_v15 = vpop.eup %3249  ;;  %v3149_v17 = vadd.f32 %v3148_v6, %v2685_v14  ;;  %v849_v18 = vpop.f32.mrb[7].mxu0  ;;  %v3669_v6 = vand.u32 4294901760, %v943_v47 }
 0x11c   :  { %v3252_v11 = vpop.eup %3251  ;;  %v952_v21 = vand.u32 4294901760, %v3250_v15  ;;  %v3151_v22 = vadd.f32 %v3150_v13, %v849_v18 }
 0x11d   :  { %v949_v25 = vand.u32 4294901760, %v3252_v11  ;;  %3261 = vtanh.f32 %v3149_v17 }
 0x11e   :  { %3263 = vtanh.f32 %v3151_v22  ;;  %v1110_v27 = vsub.f32 %v3250_v15, %v952_v21 }
 0x11f   :  { %v3254_v28 = vpop.eup %3253  ;;  %v3628_v29 = vpack.c.bf16 %v952_v21, %v949_v25  ;;  %v1103_v30 = vsub.f32 %v3252_v11, %v949_v25 }
 0x120   :  { %v3256_v35 = vpop.eup %3255  ;;  %v958_v36 = vand.u32 4294901760, %v3254_v28  ;;  %v1111_v37 = vand.u32 4294901760, %v1110_v27 }
 0x121   :  { %v955_v40 = vand.u32 4294901760, %v3256_v35  ;;  %2969 = vmatprep.subr.bf16.mxu1 %v3628_v29  ;;  %v1104_v41 = vand.u32 4294901760, %v1103_v30  ;;  %v3653_v44 = vpack.c.bf16 %v1110_v27, %v1103_v30 }
 0x122   :  { %2971 = vmatpush3.bf16.msra.mxu1 %v3628_v29  ;;  %v1112_v45 = vsub.f32 %v1110_v27, %v1111_v37  ;;  %v1124_v46 = vsub.f32 %v3254_v28, %v958_v36 }
 0x123   :  { %v3258_v49 = vpop.eup %3257  ;;  %v3658_v50 = vpack.c.bf16 %v958_v36, %v955_v40  ;;  %v1105_v51 = vsub.f32 %v1103_v30, %v1104_v41  ;;  %v1117_v52 = vsub.f32 %v3256_v35, %v955_v40  ;;  %v3660_v53 = vpack.c.bf16 %v1111_v37, %v1104_v41 }
 0x124   :  { %v3260_v54 = vpop.eup %3259  ;;  %v964_v57 = vand.u32 4294901760, %v3258_v49  ;;  %v1113_v58 = vand.u32 4294901760, %v1112_v45  ;;  %v1125_v60 = vand.u32 4294901760, %v1124_v46  ;;  %v3683_v36 = vsub.f32 %v943_v47, %v3669_v6 }
 0x125   :  { %v961_v62 = vand.u32 4294901760, %v3260_v54  ;;  %2973 = vmatprep.subr.bf16.mxu1 %v3658_v50  ;;  %v1106_v63 = vand.u32 4294901760, %v1105_v51  ;;  %v1118_v0 = vand.u32 4294901760, %v1117_v52  ;;  %v3666_v3 = vpack.c.bf16 %v1124_v46, %v1117_v52 }
 0x126   :  { %2975 = vmatpush3.bf16.msra.mxu1 %v3658_v50  ;;  %v1126_v4 = vsub.f32 %v1124_v46, %v1125_v60  ;;  %v1138_v5 = vsub.f32 %v3258_v49, %v964_v57  ;;  %v1073_v49 = vand.u32 4294901760, %v3663_v61 }
 0x127   :  { %v3262_v9 = vpop.eup %3261  ;;  %v3673_v13 = vpack.c.bf16 %v964_v57, %v961_v62  ;;  %v2984_v14 = vpack.c.bf16 %v1113_v58, %v1106_v63  ;;  %v1119_v15 = vsub.f32 %v1117_v52, %v1118_v0  ;;  %v1131_v17 = vsub.f32 %v3260_v54, %v961_v62 }
 0x128   :  { %v3264_v18 = vpop.eup %3263  ;;  %v970_v11 = vand.u32 4294901760, %v3262_v9  ;;  %v1127_v21 = vand.u32 4294901760, %v1126_v4  ;;  %v1139_v22 = vand.u32 4294901760, %v1138_v5  ;;  %v3675_v24 = vpack.c.bf16 %v1125_v60, %v1118_v0 }
 0x129   :  { %v967_v25 = vand.u32 4294901760, %v3264_v18  ;;  %2977 = vmatprep.subr.bf16.mxu1 %v3673_v13  ;;  %v1120_v27 = vand.u32 4294901760, %v1119_v15  ;;  %v1132_v28 = vand.u32 4294901760, %v1131_v17  ;;  %v3678_v30 = vpack.c.bf16 %v1138_v5, %v1131_v17 }
 0x12a   :  { %2979 = vmatpush3.bf16.msra.mxu1 %v3673_v13  ;;  %v1140_v33 = vsub.f32 %v1138_v5, %v1139_v22  ;;  %v1152_v35 = vsub.f32 %v3262_v9, %v970_v11  ;;  %v3692_v58 = vsub.f32 %v946_v48, %v3671_v8  ;;  %v1045_v60 = vand.u32 4294901760, %v3642_v38 }
 0x12b   :  { %v3685_v37 = vpack.c.bf16 %v970_v11, %v967_v25  ;;  %v2988_v40 = vpack.c.bf16 %v1127_v21, %v1120_v27  ;;  %v1133_v41 = vsub.f32 %v1131_v17, %v1132_v28  ;;  %v1145_v45 = vsub.f32 %v3264_v18, %v967_v25 }
 0x12c   :  { %v1141_v46 = vand.u32 4294901760, %v1140_v33  ;;  %v1153_v51 = vand.u32 4294901760, %v1152_v35  ;;  %v3688_v52 = vpack.c.bf16 %v1139_v22, %v1132_v28  ;;  %v1064_v62 = vsub.f32 %v3645_v39, %v1063_v34 }
 0x12d   :  { %2981 = vmatprep.subr.bf16.mxu1 %v3685_v37  ;;  %v1134_v54 = vand.u32 4294901760, %v1133_v41  ;;  %v1146_v57 = vand.u32 4294901760, %v1145_v45  ;;  %v3012_v47 = vpack.c.bf16 %v1152_v35, %v1145_v45  ;;  %v1083_v0 = vand.u32 4294901760, %v3683_v36 }
 0x12e   :  { %2983 = vmatpush3.bf16.msra.mxu1 %v3685_v37  ;;  %v1154_v63 = vsub.f32 %v1152_v35, %v1153_v51  ;;  %v1055_v48 = vand.u32 4294901760, %v3651_v42  ;;  %v1074_v38 = vsub.f32 %v3663_v61, %v1073_v49  ;;  %v1093_v18 = vand.u32 4294901760, %v3692_v58 }
 0x12f   :  { %2985 = vmatprep.subr.bf16.mxu1 %v2984_v14  ;;  %v2992_v4 = vpack.c.bf16 %v1141_v46, %v1134_v54  ;;  %v1147_v5 = vsub.f32 %v1145_v45, %v1146_v57  ;;  %v3700_v9 = vpack.c.bf16 %v1153_v51, %v1146_v57  ;;  %v1065_v11 = vand.u32 4294901760, %v1064_v62 }
 0x130   :  { %v1155_v15 = vand.u32 4294901760, %v1154_v63  ;;  %v1084_v21 = vsub.f32 %v3683_v36, %v1083_v0  ;;  %v1075_v19 = vand.u32 4294901760, %v1074_v38 }
 0x131   :  { %2703 = vmatmul.mubr.f32.vlgmr.msra.gmra.mrb[8].mxu1 %v1035_v31  ;;  %v1148_v17 = vand.u32 4294901760, %v1147_v5  ;;  %v1094_v31 = vsub.f32 %v3692_v58, %v1093_v18 }
 0x132   :  { %2987 = vmatpush3.bf16.msra.mxu1 %v2984_v14  ;;  %2705 = vmatprep.mubr.f32.mxu1 %v1045_v60  ;;  %v1085_v42 = vand.u32 4294901760, %v1084_v21  ;;  %v891_v21 = vpop.permute.xlu1 %890 }
 0x133   :  { %2989 = vmatprep.subr.bf16.mxu1 %v2988_v40  ;;  %v2996_v22 = vpack.c.bf16 %v1155_v15, %v1148_v17  ;;  %v1095_v14 = vand.u32 4294901760, %v1094_v31  ;;  %v886_v17 = vpop.permute.xlu0 %885 }
 0x135   :  { %2706 = vmatmul.mubr.f32.gmra.mrb[10].mxu1 %v1055_v48 }
 0x136   :  { %2991 = vmatpush3.bf16.msra.mxu1 %v2988_v40  ;;  %2708 = vmatprep.mubr.f32.mxu1 %v1065_v11 }
 0x137   :  { %2993 = vmatprep.subr.bf16.mxu1 %v2992_v4 }
 0x139   :  { %2709 = vmatmul.mubr.f32.gmra.mrb[12].mxu1 %v1075_v19 }
 0x13a   :  { %2995 = vmatpush3.bf16.msra.mxu1 %v2992_v4  ;;  %2711 = vmatprep.mubr.f32.mxu1 %v1085_v42  ;;  %v896_v42 = vpop.permute.xlu0 %895 }
 0x13b   :  { %2997 = vmatprep.subr.bf16.mxu1 %v2996_v22 }
 0x13d   :  { %2712 = vmatmul.mubr.f32.gmra.mrb[14].mxu1 %v1095_v14 }
 0x13e   :  { %2999 = vmatpush3.bf16.msra.mxu1 %v2996_v22  ;;  %2730 = vmatprep.mubr.f32.mxu1 %v3574_v12 }
 0x13f   :  { %3001 = vmatprep.subr.bf16.mxu1 %v3653_v44 }
 0x141   :  { %2731 = vmatmul.mubr.f32.vlgmr.msra.gmra.mrb[8].mxu1 %v3590_v43 }
 0x142   :  { %3003 = vmatpush3.bf16.msra.mxu1 %v3653_v44  ;;  %2733 = vmatprep.mubr.f32.mxu1 %v3600_v56 }
 0x143   :  { %3005 = vmatprep.subr.bf16.mxu1 %v3666_v3 }
 0x145   :  { %2734 = vmatmul.mubr.f32.gmra.mrb[10].mxu1 %v3602_v59 }
 0x146   :  { %3007 = vmatpush3.bf16.msra.mxu1 %v3666_v3  ;;  %2736 = vmatprep.mubr.f32.mxu1 %v3624_v23 }
 0x147   :  { %3009 = vmatprep.subr.bf16.mxu1 %v3678_v30 }
 0x149   :  { %2737 = vmatmul.mubr.f32.gmra.mrb[12].mxu1 %v3631_v32 }
 0x14a   :  { %3011 = vmatpush3.bf16.msra.mxu1 %v3678_v30  ;;  %2739 = vmatprep.mubr.f32.mxu1 %v3669_v6 }
 0x14b   :  { %3013 = vmatprep.subr.bf16.mxu1 %v3012_v47 }
 0x14d   :  { %2740 = vmatmul.mubr.f32.gmra.mrb[14].mxu1 %v3671_v8 }
 0x14e   :  { %3015 = vmatpush3.bf16.msra.mxu1 %v3012_v47  ;;  %2758 = vmatprep.mubr.f32.mxu1 %v3577_v16  ;;  %v1794_v16 = vld [vmem:[%s4014_s5] sm:$0xff] }
 0x14f   :  { %3017 = vmatprep.subr.bf16.mxu1 %v3628_v29 }
 0x151   :  { %2759 = vmatmul.mubr.f32.vlgmr.msra.gmra.mrb[8].mxu1 %v3598_v55  ;;  %v1845_v55 = vand.u32 4294901760, %v1794_v16 }
 0x152   :  { %3019 = vmatpush3.bf16.msra.mxu1 %v3628_v29  ;;  %2761 = vmatprep.mubr.f32.mxu1 %v3609_v2  ;;  %v3815_v2 = vld [vmem:[%s4014_s5 + $0x20] sm:$0xff] }
 0x153   :  { %3021 = vmatprep.subr.bf16.mxu1 %v3658_v50 }
 0x155   :  { %2762 = vmatmul.mubr.f32.gmra.mrb[10].mxu1 %v3612_v7  ;;  %v3820_v7 = vld [vmem:[%s4014_s5 + $0x28] sm:$0xff] }
 0x156   :  { %3023 = vmatpush3.bf16.msra.mxu1 %v3658_v50  ;;  %2764 = vmatprep.mubr.f32.mxu1 %v3645_v39  ;;  %v3835_v39 = vsub.f32 %v1794_v16, %v1845_v55 }
 0x157   :  { %3025 = vmatprep.subr.bf16.mxu1 %v3673_v13 }
 0x159   :  { %2765 = vmatmul.mubr.f32.gmra.mrb[12].mxu1 %v3663_v61 }
 0x15a   :  { %3027 = vmatpush3.bf16.msra.mxu1 %v3673_v13  ;;  %2767 = vmatprep.mubr.f32.mxu1 %v3683_v36 }
 0x15b   :  { %3029 = vmatprep.subr.bf16.mxu1 %v3685_v37 }
 0x15d   :  { %2768 = vmatmul.mubr.f32.gmra.mrb[14].mxu1 %v3692_v58 }
 0x15e   :  { %3031 = vmatpush3.bf16.msra.mxu1 %v3685_v37  ;;  %2786 = vmatprep.mubr.f32.mxu1 %v1023_v20  ;;  %v3802_v20 = vld [vmem:[%s4014_s5 + $0x10] sm:$0xff] }
 0x15f   :  { %3033 = vmatprep.subr.bf16.mxu1 %v3660_v53 }
 0x161   :  { %2787 = vmatmul.mubr.f32.vlgmr.msra.gmra.mrb[8].mxu1 %v1033_v1  ;;  %v1851_v1 = vand.u32 4294901760, %v3802_v20 }
 0x162   :  { %3035 = vmatpush3.bf16.msra.mxu1 %v3660_v53  ;;  %2789 = vmatprep.mubr.f32.mxu1 %v1043_v10 }
 0x163   :  { %3037 = vmatprep.subr.bf16.mxu1 %v3675_v24 }
 0x165   :  { %2790 = vmatmul.mubr.f32.gmra.mrb[10].mxu1 %v1053_v26  ;;  %v1860_v26 = vand.u32 4294901760, %v3820_v7 }
 0x166   :  { %3039 = vmatpush3.bf16.msra.mxu1 %v3675_v24  ;;  %2792 = vmatprep.mubr.f32.mxu1 %v1063_v34 }
 0x167   :  { %3041 = vmatprep.subr.bf16.mxu1 %v3688_v52 }
 0x169   :  { %2793 = vmatmul.mubr.f32.gmra.mrb[12].mxu1 %v1073_v49 }
 0x16a   :  { %3043 = vmatpush3.bf16.msra.mxu1 %v3688_v52  ;;  %2795 = vmatprep.mubr.f32.mxu1 %v1083_v0 }
 0x16b   :  { %3045 = vmatprep.subr.bf16.mxu1 %v3700_v9 }
 0x16d   :  { %2796 = vmatmul.mubr.f32.gmra.mrb[14].mxu1 %v1093_v18 }
 0x16e   :  { %3047 = vmatpush3.bf16.msra.mxu1 %v3700_v9  ;;  %2814 = vmatprep.mubr.f32.mxu1 %v3574_v12 }
 0x16f   :  { %3049 = vmatprep.subr.bf16.mxu1 %v3628_v29 }
 0x171   :  { %2815 = vmatmul.mubr.f32.vlgmr.msra.gmra.mrb[8].mxu1 %v3590_v43 }
 0x172   :  { %3051 = vmatpush3.bf16.msra.mxu1 %v3628_v29  ;;  %2817 = vmatprep.mubr.f32.mxu1 %v3600_v56  ;;  %v3828_v29 = vld [vmem:[%s4014_s5 + $0x30] sm:$0xff] }
 0x173   :  { %3053 = vmatprep.subr.bf16.mxu1 %v3658_v50 }
 0x175   :  { %2818 = vmatmul.mubr.f32.gmra.mrb[10].mxu1 %v3602_v59 }
 0x176   :  { %3055 = vmatpush3.bf16.msra.mxu1 %v3658_v50  ;;  %2820 = vmatprep.mubr.f32.mxu1 %v3624_v23  ;;  %v3842_v50 = vsub.f32 %v3802_v20, %v1851_v1 }
 0x177   :  { %3057 = vmatprep.subr.bf16.mxu1 %v3673_v13 }
 0x178   :  { %v1944_v25 = vand.u32 4294901760, %v3842_v50 }
 0x179   :  { %2821 = vmatmul.mubr.f32.gmra.mrb[12].mxu1 %v3631_v32 }
 0x17a   :  { %3059 = vmatpush3.bf16.msra.mxu1 %v3673_v13  ;;  %2823 = vmatprep.mubr.f32.mxu1 %v3669_v6  ;;  %v1930_v13 = vand.u32 4294901760, %v3835_v39 }
 0x17b   :  { %3061 = vmatprep.subr.bf16.mxu1 %v3685_v37 }
 0x17c   :  { %v1931_v35 = vsub.f32 %v3835_v39, %v1930_v13 }
 0x17d   :  { %2824 = vmatmul.mubr.f32.gmra.mrb[14].mxu1 %v3671_v8 }
 0x17e   :  { %3063 = vmatpush3.bf16.msra.mxu1 %v3685_v37  ;;  %2842 = vmatprep.mubr.f32.mxu1 %v3574_v12  ;;  %v1795_v12 = vld [vmem:[%s4014_s5 + $0x8] sm:$0xff]  ;;  %v1945_v37 = vsub.f32 %v3842_v50, %v1944_v25  ;;  %v1932_v51 = vand.u32 4294901760, %v1931_v35 }
 0x180   :  { %v1946_v54 = vand.u32 4294901760, %v1945_v37 }
 0x181   :  { %2843 = vmatmul.mubr.f32.vlgmr.msra.gmra.mrb[8].mxu1 %v3590_v43  ;;  %v3306_v43 = vmov 0.0|0.0  }
 0x182   :  { %2845 = vmatprep.mubr.f32.mxu1 %v3600_v56  ;;  %3076 = vmatprep.subr.bf16.mxu0 %v3306_v43  ;;  %v1848_v56 = vand.u32 4294901760, %v1795_v12 }
 0x183   :  { %3064 = vmatprep.subr.bf16.mxu1 %v3306_v43 }
 0x184   :  { %v3837_v44 = vsub.f32 %v1795_v12, %v1848_v56  ;;  %v3844_v53 = vpack.c.bf16 %v1848_v56, %v1845_v55  ;;  %v901_v55 = vpop.permute.xlu1 %900 }
 0x185   :  { %2846 = vmatmul.mubr.f32.gmra.mrb[10].mxu1 %v3602_v59  ;;  %v3808_v59 = vld [vmem:[%s4014_s5 + $0x18] sm:$0xff] }
 0x186   :  { %2848 = vmatprep.mubr.f32.mxu1 %v3624_v23  ;;  %v1854_v10 = vand.u32 4294901760, %v3808_v59  ;;  %v1857_v23 = vand.u32 4294901760, %v3815_v2  ;;  %v1937_v24 = vand.u32 4294901760, %v3837_v44  ;;  %3066 = vmatpush3.bf16.msra.mxu1 %v3844_v53 }
 0x187   :  { %3067 = vmatprep.subr.bf16.mxu1 %v3306_v43 }
 0x188   :  { %v3849_v61 = vsub.f32 %v3808_v59, %v1854_v10  ;;  %v3854_v3 = vsub.f32 %v3815_v2, %v1857_v23  ;;  %v1938_v36 = vsub.f32 %v3837_v44, %v1937_v24  ;;  %v3925_v20 = vpack.c.bf16 %v1860_v26, %v1857_v23 }
 0x189   :  { %2849 = vmatmul.mubr.f32.gmra.mrb[12].mxu1 %v3631_v32  ;;  %v3833_v32 = vld [vmem:[%s4014_s5 + $0x38] sm:$0xff] }
 0x18a   :  { %2851 = vmatprep.mubr.f32.mxu1 %v3669_v6  ;;  %v3859_v6 = vsub.f32 %v3820_v7, %v1860_v26  ;;  %v1866_v27 = vand.u32 4294901760, %v3833_v32  ;;  %v1951_v28 = vand.u32 4294901760, %v3849_v61  ;;  %v1958_v30 = vand.u32 4294901760, %v3854_v3 }
 0x18b   :  { %v1939_v52 = vand.u32 4294901760, %v1938_v36 }
 0x18c   :  { %v1965_v33 = vand.u32 4294901760, %v3859_v6  ;;  %v3888_v40 = vsub.f32 %v3833_v32, %v1866_v27  ;;  %v1952_v41 = vsub.f32 %v3849_v61, %v1951_v28  ;;  %v1959_v45 = vsub.f32 %v3854_v3, %v1958_v30 }
 0x18d   :  { %2852 = vmatmul.mubr.f32.gmra.mrb[14].mxu1 %v3671_v8  ;;  %v1863_v8 = vand.u32 4294901760, %v3828_v29  ;;  %v3077_v47 = vpack.c.bf16 %v1939_v52, %v1932_v51  ;;  %v911_v52 = vpop.permute.xlu1 %910 }
 0x18e   :  { %v1966_v46 = vsub.f32 %v3859_v6, %v1965_v33  ;;  %v1979_v57 = vand.u32 4294901760, %v3888_v40  ;;  %v1953_v58 = vand.u32 4294901760, %v1952_v41  ;;  %v1960_v60 = vand.u32 4294901760, %v1959_v45  ;;  %v906_v41 = vpop.permute.xlu0 %905 }
 0x18f   :  { %v3874_v34 = vsub.f32 %v3828_v29, %v1863_v8  ;;  %3078 = vmatpush3.bf16.msra.mxu0 %v3077_v47  ;;  %v3915_v45 = vpack.c.bf16 %v1854_v10, %v1851_v1  ;;  %v3935_v2 = vpack.c.bf16 %v1866_v27, %v1863_v8  ;;  %v3089_v27 = vpack.c.bf16 %v3837_v44, %v3835_v39 }
 0x190   :  { %v3080_v62 = vpack.c.bf16 %v1953_v58, %v1946_v54  ;;  %v1967_v63 = vand.u32 4294901760, %v1966_v46  ;;  %v1980_v4 = vsub.f32 %v3888_v40, %v1979_v57  ;;  %3079 = vmatprep.subr.bf16.mxu0 %v3306_v43  ;;  %v3308_v54 = vmov 0.0  }
 0x191   :  { %v1972_v49 = vand.u32 4294901760, %v3874_v34  ;;  %3069 = vmatpush3.bf16.msra.mxu1 %v3915_v45  ;;  %2889 = vmatprep.mubr.msk.f32.mxu0 %vm3307_vm2, %v3308_v54  ;;  %v921_v26 = vpop.permute.xlu1 %920  ;;  %v3119_v39 = vpack.c.bf16 %v1965_v33, %v1958_v30 }
 0x192   :  { %v3083_v5 = vpack.c.bf16 %v1967_v63, %v1960_v60  ;;  %v1981_v15 = vand.u32 4294901760, %v1980_v4  ;;  %3070 = vmatprep.subr.bf16.mxu1 %v3306_v43  ;;  %2870 = vmatprep.mubr.msk.f32.mxu1 %vm3307_vm2, %v3308_v54  ;;  %v916_v10 = vpop.permute.xlu0 %915  ;;  %v3092_v4 = vpack.c.bf16 %v3849_v61, %v3842_v50 }
 0x193   :  { %v1973_v0 = vsub.f32 %v3874_v34, %v1972_v49  ;;  %3081 = vmatpush3.bf16.msra.mxu0 %v3080_v62  ;;  %v3122_v44 = vpack.c.bf16 %v1979_v57, %v1972_v49 }
 0x194   :  { %3082 = vmatprep.subr.bf16.mxu0 %v3306_v43 }
 0x195   :  { %v1974_v9 = vand.u32 4294901760, %v1973_v0  ;;  %3072 = vmatpush3.bf16.msra.mxu1 %v3925_v20 }
 0x196   :  { %3073 = vmatprep.subr.bf16.mxu1 %v3306_v43 }
 0x197   :  { %3084 = vmatpush3.bf16.msra.mxu0 %v3083_v5  ;;  %v3086_v48 = vpack.c.bf16 %v1981_v15, %v1974_v9  ;;  %v3095_v15 = vpack.c.bf16 %v3859_v6, %v3854_v3 }
 0x198   :  { %3085 = vmatprep.subr.bf16.mxu0 %v3306_v43 }
 0x199   :  { %3075 = vmatpush3.bf16.msra.mxu1 %v3935_v2 }
 0x19b   :  { %3087 = vmatpush3.bf16.msra.mxu0 %v3086_v48 }
 0x19c   :  { %3088 = vmatprep.subr.bf16.mxu0 %v3306_v43 }
 0x254   :  { %v2844_v38 = vpop.f32.mrb[8].mxu1 }
 0x255   :  { %v1740_v18 = vpop.f32.mrb[9].mxu1  ;;  %v3152_v22 = vadd.f32 %v2844_v38, %v891_v21  ;;  %v3098_v38 = vpack.c.bf16 %v3888_v40, %v3874_v34 }
 0x256   :  { %v3153_v11 = vadd.f32 %v1740_v18, %v886_v17  ;;  %v3113_v17 = vpack.c.bf16 %v1937_v24, %v1930_v13  ;;  %v3116_v18 = vpack.c.bf16 %v1951_v28, %v1944_v25 }
 0x258   :  { %3265 = vtanh.f32 %v3153_v11  ;;  %v2847_v19 = vpop.f32.mrb[10].mxu1 }
 0x259   :  { %v1752_v31 = vpop.f32.mrb[11].mxu1  ;;  %3267 = vtanh.f32 %v3152_v22  ;;  %v3154_v56 = vadd.f32 %v2847_v19, %v901_v55 }
 0x25a   :  { %v3155_v14 = vadd.f32 %v1752_v31, %v896_v42 }
 0x25c   :  { %v2850_v16 = vpop.f32.mrb[12].mxu1  ;;  %3269 = vtanh.f32 %v3155_v14 }
 0x25d   :  { %v1764_v12 = vpop.f32.mrb[13].mxu1  ;;  %3271 = vtanh.f32 %v3154_v56  ;;  %v3156_v59 = vadd.f32 %v2850_v16, %v911_v52 }
 0x25e   :  { %v3157_v46 = vadd.f32 %v1764_v12, %v906_v41 }
 0x260   :  { %v2853_v35 = vpop.f32.mrb[14].mxu1  ;;  %3273 = vtanh.f32 %v3157_v46 }
 0x261   :  { %v1776_v36 = vpop.f32.mrb[15].mxu1  ;;  %3275 = vtanh.f32 %v3156_v59  ;;  %v3158_v58 = vadd.f32 %v2853_v35, %v921_v26 }
 0x262   :  { %v3266_v37 = vpop.eup %3265  ;;  %v3159_v7 = vadd.f32 %v1776_v36, %v916_v10 }
 0x263   :  { %1809 = vxpose.xlu0.b32.start [1/8] (short) (narrow) %v3266_v37, 8  ;;  %v3268_v51 = vpop.eup %3267 }
 0x264   :  { %3277 = vtanh.f32 %v3159_v7 }
 0x265   :  { %3279 = vtanh.f32 %v3158_v58 }
 0x266   :  { %v3270_v1 = vpop.eup %3269 }
 0x267   :  { %1810 = vxpose.xlu0.b32.cont [2/8] (short) (narrow) %v3268_v51, 8  ;;  %v3272_v23 = vpop.eup %3271 }
 0x26a   :  { %v3274_v47 = vpop.eup %3273 }
 0x26b   :  { %1811 = vxpose.xlu0.b32.cont [3/8] (short) (narrow) %v3270_v1, 8  ;;  %v3276_v60 = vpop.eup %3275 }
 0x26e   :  { %v3278_v62 = vpop.eup %3277 }
 0x26f   :  { %1812 = vxpose.xlu0.b32.cont [4/8] (short) (narrow) %v3272_v23, 8  ;;  %v3280_v29 = vpop.eup %3279 }
 0x273   :  { %1813 = vxpose.xlu0.b32.cont [5/8] (short) (narrow) %v3274_v47, 8 }
 0x277   :  { %1814 = vxpose.xlu0.b32.cont [6/8] (short) (narrow) %v3276_v60, 8 }
 0x27b   :  { %1815 = vxpose.xlu0.b32.cont [7/8] (short) (narrow) %v3278_v62, 8 }
 0x27f   :  { %1816 = vxpose.xlu0.b32.end [8/8] (short) (narrow) %v3280_v29, 8 }
 0x2e3   :  { %v1825_v32 = vpop.trf.xlu0 }
 0x2e4   :  { %v1842_v8 = vsel %vm923_vm1, %v1825_v32, 0 }
 0x2e5   :  { %v1917_v63 = vand.u32 4294901760, %v1842_v8 }
 0x2e7   :  { %v1918_v0 = vsub.f32 %v1842_v8, %v1917_v63  ;;  %2890 = vmatmul.mubr.f32.vlgmr.msra.gmra.mrb[8].mxu0 %v1917_v63 }
 0x2e8   :  { %3090 = vmatpush3.bf16.msra.mxu0 %v3089_v27  ;;  %2908 = vmatprep.mubr.msk.f32.mxu0 %vm3307_vm2, %v3308_v54 }
 0x2e9   :  { %v1919_v5 = vand.u32 4294901760, %v1918_v0  ;;  %3091 = vmatprep.subr.bf16.mxu0 %v3306_v43 }
 0x2eb   :  { %v1920_v9 = vsub.f32 %v1918_v0, %v1919_v5 }
 0x2ec   :  { %3093 = vmatpush3.bf16.msra.mxu0 %v3092_v4 }
 0x2ed   :  { %v1921_v48 = vand.u32 4294901760, %v1920_v9  ;;  %3094 = vmatprep.subr.bf16.mxu0 %v3306_v43 }
 0x2ef   :  { %2871 = vmatmul.mubr.f32.vlgmr.msra.gmra.mrb[16].mxu1 %v1921_v48 }
 0x2f0   :  { %3096 = vmatpush3.bf16.msra.mxu0 %v3095_v15 }
 0x2f1   :  { %3097 = vmatprep.subr.bf16.mxu0 %v3306_v43 }
 0x2f4   :  { %3099 = vmatpush3.bf16.msra.mxu0 %v3098_v38 }
 0x2f5   :  { %3100 = vmatprep.subr.bf16.mxu0 %v3306_v43 }
 0x2f7   :  { %2909 = vmatmul.mubr.f32.vlgmr.msra.gmra.mrb[8].mxu0 %v1918_v0 }
 0x2f8   :  { %3102 = vmatpush3.bf16.msra.mxu0 %v3844_v53  ;;  %2927 = vmatprep.mubr.msk.f32.mxu0 %vm3307_vm2, %v3308_v54 }
 0x2f9   :  { %3103 = vmatprep.subr.bf16.mxu0 %v3306_v43 }
 0x2fc   :  { %3105 = vmatpush3.bf16.msra.mxu0 %v3915_v45 }
 0x2fd   :  { %3106 = vmatprep.subr.bf16.mxu0 %v3306_v43 }
 0x300   :  { %3108 = vmatpush3.bf16.msra.mxu0 %v3925_v20 }
 0x301   :  { %3109 = vmatprep.subr.bf16.mxu0 %v3306_v43 }
 0x304   :  { %3111 = vmatpush3.bf16.msra.mxu0 %v3935_v2 }
 0x305   :  { %3112 = vmatprep.subr.bf16.mxu0 %v3306_v43 }
 0x307   :  { %2928 = vmatmul.mubr.f32.vlgmr.msra.gmra.mrb[8].mxu0 %v1919_v5 }
 0x308   :  { %3114 = vmatpush3.bf16.msra.mxu0 %v3113_v17  ;;  %2946 = vmatprep.mubr.msk.f32.mxu0 %vm3307_vm2, %v3308_v54 }
 0x309   :  { %3115 = vmatprep.subr.bf16.mxu0 %v3306_v43 }
 0x30c   :  { %3117 = vmatpush3.bf16.msra.mxu0 %v3116_v18 }
 0x30d   :  { %3118 = vmatprep.subr.bf16.mxu0 %v3306_v43 }
 0x310   :  { %3120 = vmatpush3.bf16.msra.mxu0 %v3119_v39 }
 0x311   :  { %3121 = vmatprep.subr.bf16.mxu0 %v3306_v43 }
 0x314   :  { %3123 = vmatpush3.bf16.msra.mxu0 %v3122_v44 }
 0x315   :  { %3124 = vmatprep.subr.bf16.mxu0 %v3306_v43 }
 0x317   :  { %2947 = vmatmul.mubr.f32.vlgmr.msra.gmra.mrb[8].mxu0 %v1917_v63 }
 0x318   :  { %3126 = vmatpush3.bf16.msra.mxu0 %v3844_v53  ;;  %2965 = vmatprep.mubr.msk.f32.mxu0 %vm3307_vm2, %v3308_v54  ;;  %v2397_v53 = vld [vmem:[%s4015_s6] ss:$0 sm:$0xff] }
 0x319   :  { %3127 = vmatprep.subr.bf16.mxu0 %v3306_v43 }
 0x31c   :  { %3129 = vmatpush3.bf16.msra.mxu0 %v3915_v45 }
 0x31d   :  { %3130 = vmatprep.subr.bf16.mxu0 %v3306_v43 }
 0x320   :  { %3132 = vmatpush3.bf16.msra.mxu0 %v3925_v20 }
 0x321   :  { %3133 = vmatprep.subr.bf16.mxu0 %v3306_v43 }
 0x324   :  { %3135 = vmatpush3.bf16.msra.mxu0 %v3935_v2 }
 0x327   :  { %2966 = vmatmul.mubr.f32.vlgmr.msra.gmra.mrb[8].mxu0 %v1917_v63 }
 0x3c2   :  { %v1923_v50 = vpop.f32.mrb[16].mxu1 }
 0x3c3   :  { %v2872_v61 = vpop.f32.mrb[17].mxu1  ;;  %v1924_v3 = vadd.f32 %v2397_v53, %v1923_v50 }
 0x3fa   :  { %v2377_v6 = vpop.f32.mrb[8].mxu0 }
 0x3fb   :  { %v3161_v13 = vadd.f32 %v2377_v6, %v1924_v3  ;;  %v2967_v24 = vpop.f32.mrb[9].mxu0 }
 0x3fd   :  { %2382 = vst.msk [vmem:[#allocation2] sm:$0x3] %vm2381_vm3, %v3161_v13 }
 0x3fe   :  { %3292 = shalt.err (!%p3289_p4)
}
 0x3ff   :  { %s3293_s6 = scalar_lea.hbm %s4016_s7, 32 }
 0x400   :  { %p3294_p5 = scmp.ne.s32.totalorder %s4016_s7, %s3293_s6  ;;  %p3297_p6 = scmp.lt.u32.totalorder %s3293_s6, %s4016_s7 }
 0x402   :  { %p3299_p7 = pnand %p3297_p6, %p3294_p5 }
 0x404   :  { %3302 = shalt.err (!%p3299_p7)
}
 0x405   :  { %2392 = dma.vmem_to_hbm [thread:$0]  %s2390_s28, 32, %s4016_s7, [#allocation3]  }
 0x406   :  { %3303 = dma.done.wait [#allocation3], 32  }
 0x407   :  { %3304 = vsyncadd [#allocation3], 4294967264 }
 0x408   :  { %2396 = vsyncpa [#allocation3], 1 }

</bundles_post_ra>
